<compile_context>
chip_gen: v6e
topology: v6e:2x2x1
jax: 0.10.0
libtpu: 0.0.40
codegen_flags: <defaults>
</compile_context>

<pallas_src>
import jax
import jax.numpy as jnp
from jax.experimental import pallas as pl
from jax.experimental.pallas import tpu as pltpu

DP = 128  # padded lane width for all hidden layers


def _round_up(x, m):
    return (x + m - 1) // m * m


def _build_kernel(n_hidden, dims, k0, use_ln, use_sigmoid, dp):
    """Fused MLP kernel. Refs: x (TB, k0), w_slab, row_slab, o (TB, 1)."""

    def kernel(x_ref, w_ref, r_ref, o_ref):
        y = x_ref[...]  # (TB, k0) f32
        for l in range(n_hidden):
            k = k0 if l == 0 else dp                     # layer 0: real K only
            w = w_ref[l * dp:l * dp + k, :]              # (k, dp) static view
            b = r_ref[l:l + 1, :]                        # (1, dp)
            # MXU matmul (hot path), f32 accumulation.
            y = jnp.dot(y, w, preferred_element_type=jnp.float32) + b
            if use_ln:
                g = r_ref[n_hidden + l:n_hidden + l + 1, :]          # (1, dp)
                beta = r_ref[2 * n_hidden + l:2 * n_hidden + l + 1, :]
                inv_h = 1.0 / float(dims[l])             # real feature count
                # Padded lanes are exactly zero, so full-lane sums == real sums.
                mean = jnp.sum(y, axis=-1, keepdims=True) * inv_h
                ex2 = jnp.sum(y * y, axis=-1, keepdims=True) * inv_h
                var = ex2 - mean * mean                  # single-pass variance
                # g/beta are zero in padded lanes -> padded lanes stay zero.
                y = (y - mean) * jax.lax.rsqrt(var + 1e-5) * g + beta
            # leaky_relu(y, 0.2)
            y = jnp.where(y > 0, y, 0.2 * y)

        base = (3 * n_hidden) if use_ln else n_hidden
        w_out = r_ref[base:base + 1, :]                  # (1, dp) output weight row
        b_out = r_ref[base + 1:base + 2, 0:1]            # (1, 1) scalar bias
        # VPU multiply + XLU cross-lane reduce instead of a 1-column MXU matmul.
        out = jnp.sum(y * w_out, axis=-1, keepdims=True) + b_out     # (TB, 1)
        if use_sigmoid:
            out = jax.nn.sigmoid(out)
        o_ref[...] = out.astype(o_ref.dtype)

    return kernel


def init_discriminator_params(key, inp_dim, dims, use_ln):
    """Deterministic synthetic parameters (weights stored (in, out), biases (1, h))."""
    params = []
    curr = inp_dim
    for h in dims:
        key, k1, k2 = jax.random.split(key, 3)
        params.append(jax.random.normal(k1, (curr, h), jnp.float32) * 0.1)
        params.append(jax.random.normal(k2, (1, h), jnp.float32) * 0.1)
        if use_ln:
            params.append(jnp.ones((1, h), jnp.float32))    # gamma (PyTorch default)
            params.append(jnp.zeros((1, h), jnp.float32))   # beta
        curr = h
    key, k1, k2 = jax.random.split(key, 3)
    params.append(jax.random.normal(k1, (curr, 1), jnp.float32) * 0.1)  # w_out
    params.append(jax.random.normal(k2, (1, 1), jnp.float32) * 0.1)     # b_out
    return params


def pack_discriminator_params(params, inp_dim, dims, use_ln, dp=DP):
    """Pack all parameters into one weight slab + one (rows, dp) row slab.

    Call ONCE per parameter update (hoisted out of the forward path) and reuse
    the returned slabs for every forward call.
    """
    n_hidden = len(dims)
    assert inp_dim <= dp and max(dims) <= dp, "layer widths must fit in one 128-lane tile"
    w_blocks, b_rows, g_rows, beta_rows = [], [], [], []
    curr = inp_dim
    idx = 0
    for h in dims:
        w, b = params[idx], params[idx + 1]
        idx += 2
        w_blocks.append(jnp.zeros((dp, dp), jnp.float32).at[:curr, :h].set(w))
        b_rows.append(jnp.zeros((1, dp), jnp.float32).at[:, :h].set(b))
        if use_ln:
            g, beta = params[idx], params[idx + 1]
            idx += 2
            # zero-pad gamma/beta so padded lanes stay exactly zero through LN
            g_rows.append(jnp.zeros((1, dp), jnp.float32).at[:, :h].set(g))
            beta_rows.append(jnp.zeros((1, dp), jnp.float32).at[:, :h].set(beta))
        curr = h
    w_out, b_out = params[idx], params[idx + 1]
    w_out_row = jnp.zeros((1, dp), jnp.float32).at[:, :curr].set(w_out.reshape(1, curr))
    b_out_row = jnp.full((1, dp), b_out.reshape(()), jnp.float32)

    rows = jnp.concatenate(b_rows + g_rows + beta_rows + [w_out_row, b_out_row], axis=0)
    r_pad = _round_up(rows.shape[0], 8)
    if r_pad != rows.shape[0]:
        rows = jnp.concatenate(
            [rows, jnp.zeros((r_pad - rows.shape[0], dp), jnp.float32)], axis=0)
    w_slab = jnp.concatenate(w_blocks, axis=0)  # (n_hidden*dp, dp)
    return w_slab, rows


def discriminator_forward(z, w_slab, row_slab, *, inp_dim, dims, use_ln=False,
                          use_sigmoid=False, tile_b=None, dp=DP):
    """Fused Pallas MLP discriminator. z: (B, inp_dim) -> (B, 1) f32."""
    n_hidden = len(dims)
    B = z.shape[0]
    k0 = _round_up(inp_dim, 8)   # sublane-align input features only (NOT to 128)

    # Batch tiling: big tiles amortize the ~0.35us/step overhead, but keep at
    # least 2 grid steps whenever B allows so v7x's 2 TensorCores both get work.
    # VMEM stays tiny even at TB=2048 (<1 MiB activations + ~130 KiB params).
    if tile_b is None:
        tile_b = min(2048, _round_up(-(-B // 2), 8))
    tile_b = max(8, _round_up(tile_b, 8))
    b_pad = _round_up(max(B, tile_b), tile_b)

    z32 = z.astype(jnp.float32)
    if b_pad != B or k0 != inp_dim:
        z_in = jnp.zeros((b_pad, k0), jnp.float32).at[:B, :inp_dim].set(z32)
    else:
        z_in = z32   # no wrapper-side pad kernel when shapes already align

    kernel = _build_kernel(n_hidden, tuple(dims), k0, use_ln, use_sigmoid, dp)
    grid = (b_pad // tile_b,)

    # Advisory cost estimate so XLA schedules neighbours around this small call.
    flops = int(b_pad * (2 * k0 * dp + 2 * dp * dp * max(n_hidden - 1, 0) + 2 * dp))
    transcendentals = int(b_pad * ((n_hidden if use_ln else 0) + (1 if use_sigmoid else 0)))
    bytes_accessed = int(4 * (b_pad * k0 + b_pad + w_slab.size + row_slab.size))

    out = pl.pallas_call(
        kernel,
        out_shape=jax.ShapeDtypeStruct((b_pad, 1), jnp.float32),
        grid=grid,
        in_specs=[
            # batch-tiled activations, real feature width only (full last dim)
            pl.BlockSpec((tile_b, k0), lambda i: (i, 0)),
            # parameter slabs: constant index_map -> stay VMEM-resident
            pl.BlockSpec(w_slab.shape, lambda i: (0, 0)),
            pl.BlockSpec(row_slab.shape, lambda i: (0, 0)),
        ],
        # (tile_b, 1) output block: 4 B/row of HBM writeback (128x less than a
        # lane-broadcast output).  On v5e, if DMA is exposed, consider
        # pipeline_mode=pl.Buffered(3) on the activation in_spec.
        out_specs=pl.BlockSpec((tile_b, 1), lambda i: (i, 0)),
        compiler_params=pltpu.CompilerParams(
            dimension_semantics=("parallel",)),
        cost_estimate=pl.CostEstimate(flops=flops,
                                      transcendentals=transcendentals,
                                      bytes_accessed=bytes_accessed),
    )(z_in, w_slab, row_slab)

    return out[:B]


def reference_forward(z, params, *, n_hidden, use_ln=False, use_sigmoid=False):
    """Pure-JAX reference mirroring the PyTorch forward."""
    y = z
    idx = 0
    for _ in range(n_hidden):
        w, b = params[idx], params[idx + 1]
        idx += 2
        y = y @ w + b
        if use_ln:
            g, beta = params[idx], params[idx + 1]
            idx += 2
            mean = jnp.mean(y, axis=-1, keepdims=True)
            var = jnp.mean((y - mean) ** 2, axis=-1, keepdims=True)
            y = (y - mean) / jnp.sqrt(var + 1e-5) * g + beta
        y = jnp.where(y > 0, y, 0.2 * y)
    w_out, b_out = params[idx], params[idx + 1]
    y = y @ w_out + b_out
    if use_sigmoid:
        y = jax.nn.sigmoid(y)
    return y


# TODO(synk): use_bn (training-mode BatchNorm1d with batch statistics and
# running-stat updates) is not implemented; this config uses use_bn=False.

if __name__ == "__main__":
    # Config (cfgmodel): inp_dim=32, dims=[64, 64], use_ln=True, use_sigmoid=True
    INP_DIM = 32
    DIMS = [64, 64]
    USE_LN = True
    USE_SIGMOID = True
    N_HID = len(DIMS)

    key = jax.random.PRNGKey(0)
    kz_small, kp, kz_big, kz_rag = jax.random.split(key, 4)
    params = init_discriminator_params(kp, INP_DIM, DIMS, USE_LN)

    # Pack parameters ONCE (hoisted out of the forward path).
    w_slab, row_slab = pack_discriminator_params(params, INP_DIM, DIMS, USE_LN)

    # 1) Small-batch path (single padded tile).
    z_small = jax.random.normal(kz_small, (8, INP_DIM), jnp.float32)
    out_s = discriminator_forward(z_small, w_slab, row_slab, inp_dim=INP_DIM,
                                  dims=DIMS, use_ln=USE_LN, use_sigmoid=USE_SIGMOID)
    out_s = jax.block_until_ready(out_s)
    ref_s = reference_forward(z_small, params, n_hidden=N_HID,
                              use_ln=USE_LN, use_sigmoid=USE_SIGMOID)
    assert out_s.shape == (8, 1), out_s.shape
    assert jnp.allclose(out_s, ref_s, atol=1e-4, rtol=1e-4), (out_s, ref_s)

    # 2) Default tile selection: >= 2 grid steps (both v7x TCs active).
    z_big = jax.random.normal(kz_big, (256, INP_DIM), jnp.float32)
    out_b = discriminator_forward(z_big, w_slab, row_slab, inp_dim=INP_DIM,
                                  dims=DIMS, use_ln=USE_LN, use_sigmoid=USE_SIGMOID)
    out_b = jax.block_until_ready(out_b)
    ref_b = reference_forward(z_big, params, n_hidden=N_HID,
                              use_ln=USE_LN, use_sigmoid=USE_SIGMOID)
    assert out_b.shape == (256, 1), out_b.shape
    assert jnp.allclose(out_b, ref_b, atol=1e-4, rtol=1e-4)

    # 3) Ragged batch (exercises batch padding + partial-tile slicing).
    z_rag = jax.random.normal(kz_rag, (200, INP_DIM), jnp.float32)
    out_r = discriminator_forward(z_rag, w_slab, row_slab, inp_dim=INP_DIM,
                                  dims=DIMS, use_ln=USE_LN, use_sigmoid=USE_SIGMOID)
    out_r = jax.block_until_ready(out_r)
    ref_r = reference_forward(z_rag, params, n_hidden=N_HID,
                              use_ln=USE_LN, use_sigmoid=USE_SIGMOID)
    assert out_r.shape == (200, 1), out_r.shape
    assert jnp.allclose(out_r, ref_r, atol=1e-4, rtol=1e-4)

    print("KERNEL_OK")
</pallas_src>

<mosaic_0001>
module attributes {stable_mosaic.version = 11 : i64} {
  func.func @kernel(%arg0: i32, %arg1: memref<8x32xf32, #tpu.memory_space<vmem>>, %arg2: memref<256x128xf32, #tpu.memory_space<vmem>>, %arg3: memref<8x128xf32, #tpu.memory_space<vmem>>, %arg4: memref<8x1xf32, #tpu.memory_space<vmem>>) attributes {dimension_semantics = [#tpu.dimension_semantics<parallel>], iteration_bounds = array<i64: 1>, scalar_prefetch = 0 : i64, scratch_operands = 0 : i64, tpu.core_type = #tpu.core_type<tc>, window_params = [{transform_indices = @transform_0, window_bounds = array<i64: 8, 32>}, {pipeline_mode = #tpu.pipeline_mode<synchronous>, transform_indices = @transform_1, window_bounds = array<i64: 256, 128>}, {pipeline_mode = #tpu.pipeline_mode<synchronous>, transform_indices = @transform_2, window_bounds = array<i64: 8, 128>}, {transform_indices = @transform_3, window_bounds = array<i64: 8, 1>}]} {
    %c0 = arith.constant 0 : index
    %c0_0 = arith.constant 0 : index
    %0 = vector.load %arg1[%c0, %c0_0] : memref<8x32xf32, #tpu.memory_space<vmem>>, vector<8x32xf32>
    %c0_1 = arith.constant 0 : index
    %c0_2 = arith.constant 0 : index
    %1 = vector.load %arg2[%c0_1, %c0_2] : memref<256x128xf32, #tpu.memory_space<vmem>>, vector<32x128xf32>
    %c0_3 = arith.constant 0 : index
    %c0_4 = arith.constant 0 : index
    %2 = vector.load %arg3[%c0_3, %c0_4] : memref<8x128xf32, #tpu.memory_space<vmem>>, vector<1x128xf32>
    %cst = arith.constant dense<0.000000e+00> : vector<8x128xf32>
    %3 = tpu.matmul %0, %1, %cst {dimension_numbers = #tpu.dot_dimension_numbers<[1], [0], [0], [1], [0, 0, 1, 1], [], []>} : vector<8x32xf32>, vector<32x128xf32>, vector<8x128xf32> -> vector<8x128xf32>
    %4 = vector.broadcast %2 : vector<1x128xf32> to vector<8x128xf32>
    %5 = arith.addf %3, %4 : vector<8x128xf32>
    %c2 = arith.constant 2 : index
    %c0_5 = arith.constant 0 : index
    %6 = vector.load %arg3[%c2, %c0_5] : memref<8x128xf32, #tpu.memory_space<vmem>>, vector<1x128xf32>
    %c4 = arith.constant 4 : index
    %c0_6 = arith.constant 0 : index
    %7 = vector.load %arg3[%c4, %c0_6] : memref<8x128xf32, #tpu.memory_space<vmem>>, vector<1x128xf32>
    %cst_7 = arith.constant dense<0.000000e+00> : vector<8xf32>
    %8 = vector.multi_reduction <add>, %5, %cst_7 [1] : vector<8x128xf32> to vector<8xf32>
    %9 = vector.shape_cast %8 : vector<8xf32> to vector<8x1xf32>
    %cst_8 = arith.constant 1.562500e-02 : f32
    %10 = vector.broadcast %cst_8 : f32 to vector<8x1xf32>
    %11 = arith.mulf %9, %10 : vector<8x1xf32>
    %12 = arith.mulf %5, %5 : vector<8x128xf32>
    %cst_9 = arith.constant dense<0.000000e+00> : vector<8xf32>
    %13 = vector.multi_reduction <add>, %12, %cst_9 [1] : vector<8x128xf32> to vector<8xf32>
    %14 = vector.shape_cast %13 : vector<8xf32> to vector<8x1xf32>
    %cst_10 = arith.constant 1.562500e-02 : f32
    %15 = vector.broadcast %cst_10 : f32 to vector<8x1xf32>
    %16 = arith.mulf %14, %15 : vector<8x1xf32>
    %17 = arith.mulf %11, %11 : vector<8x1xf32>
    %18 = arith.subf %16, %17 : vector<8x1xf32>
    %19 = vector.broadcast %11 : vector<8x1xf32> to vector<8x128xf32>
    %20 = arith.subf %5, %19 : vector<8x128xf32>
    %cst_11 = arith.constant 9.99999974E-6 : f32
    %21 = vector.broadcast %cst_11 : f32 to vector<8x1xf32>
    %22 = arith.addf %18, %21 : vector<8x1xf32>
    %23 = math.rsqrt %22 : vector<8x1xf32>
    %24 = vector.broadcast %23 : vector<8x1xf32> to vector<8x128xf32>
    %25 = arith.mulf %20, %24 : vector<8x128xf32>
    %26 = vector.broadcast %6 : vector<1x128xf32> to vector<8x128xf32>
    %27 = arith.mulf %25, %26 : vector<8x128xf32>
    %28 = vector.broadcast %7 : vector<1x128xf32> to vector<8x128xf32>
    %29 = arith.addf %27, %28 : vector<8x128xf32>
    %cst_12 = arith.constant 0.000000e+00 : f32
    %30 = vector.broadcast %cst_12 : f32 to vector<8x128xf32>
    %31 = arith.cmpf ogt, %29, %30 : vector<8x128xf32>
    %cst_13 = arith.constant 2.000000e-01 : f32
    %32 = vector.broadcast %cst_13 : f32 to vector<8x128xf32>
    %33 = arith.mulf %32, %29 : vector<8x128xf32>
    %34 = arith.select %31, %29, %33 : vector<8x128xi1>, vector<8x128xf32>
    %c128 = arith.constant 128 : index
    %c0_14 = arith.constant 0 : index
    %35 = vector.load %arg2[%c128, %c0_14] : memref<256x128xf32, #tpu.memory_space<vmem>>, vector<128x128xf32>
    %c1 = arith.constant 1 : index
    %c0_15 = arith.constant 0 : index
    %36 = vector.load %arg3[%c1, %c0_15] : memref<8x128xf32, #tpu.memory_space<vmem>>, vector<1x128xf32>
    %cst_16 = arith.constant dense<0.000000e+00> : vector<8x128xf32>
    %37 = tpu.matmul %34, %35, %cst_16 {dimension_numbers = #tpu.dot_dimension_numbers<[1], [0], [0], [1], [0, 0, 1, 1], [], []>} : vector<8x128xf32>, vector<128x128xf32>, vector<8x128xf32> -> vector<8x128xf32>
    %38 = vector.broadcast %36 : vector<1x128xf32> to vector<8x128xf32>
    %39 = arith.addf %37, %38 : vector<8x128xf32>
    %c3 = arith.constant 3 : index
    %c0_17 = arith.constant 0 : index
    %40 = vector.load %arg3[%c3, %c0_17] : memref<8x128xf32, #tpu.memory_space<vmem>>, vector<1x128xf32>
    %c5 = arith.constant 5 : index
    %c0_18 = arith.constant 0 : index
    %41 = vector.load %arg3[%c5, %c0_18] : memref<8x128xf32, #tpu.memory_space<vmem>>, vector<1x128xf32>
    %cst_19 = arith.constant dense<0.000000e+00> : vector<8xf32>
    %42 = vector.multi_reduction <add>, %39, %cst_19 [1] : vector<8x128xf32> to vector<8xf32>
    %43 = vector.shape_cast %42 : vector<8xf32> to vector<8x1xf32>
    %cst_20 = arith.constant 1.562500e-02 : f32
    %44 = vector.broadcast %cst_20 : f32 to vector<8x1xf32>
    %45 = arith.mulf %43, %44 : vector<8x1xf32>
    %46 = arith.mulf %39, %39 : vector<8x128xf32>
    %cst_21 = arith.constant dense<0.000000e+00> : vector<8xf32>
    %47 = vector.multi_reduction <add>, %46, %cst_21 [1] : vector<8x128xf32> to vector<8xf32>
    %48 = vector.shape_cast %47 : vector<8xf32> to vector<8x1xf32>
    %cst_22 = arith.constant 1.562500e-02 : f32
    %49 = vector.broadcast %cst_22 : f32 to vector<8x1xf32>
    %50 = arith.mulf %48, %49 : vector<8x1xf32>
    %51 = arith.mulf %45, %45 : vector<8x1xf32>
    %52 = arith.subf %50, %51 : vector<8x1xf32>
    %53 = vector.broadcast %45 : vector<8x1xf32> to vector<8x128xf32>
    %54 = arith.subf %39, %53 : vector<8x128xf32>
    %cst_23 = arith.constant 9.99999974E-6 : f32
    %55 = vector.broadcast %cst_23 : f32 to vector<8x1xf32>
    %56 = arith.addf %52, %55 : vector<8x1xf32>
    %57 = math.rsqrt %56 : vector<8x1xf32>
    %58 = vector.broadcast %57 : vector<8x1xf32> to vector<8x128xf32>
    %59 = arith.mulf %54, %58 : vector<8x128xf32>
    %60 = vector.broadcast %40 : vector<1x128xf32> to vector<8x128xf32>
    %61 = arith.mulf %59, %60 : vector<8x128xf32>
    %62 = vector.broadcast %41 : vector<1x128xf32> to vector<8x128xf32>
    %63 = arith.addf %61, %62 : vector<8x128xf32>
    %cst_24 = arith.constant 0.000000e+00 : f32
    %64 = vector.broadcast %cst_24 : f32 to vector<8x128xf32>
    %65 = arith.cmpf ogt, %63, %64 : vector<8x128xf32>
    %cst_25 = arith.constant 2.000000e-01 : f32
    %66 = vector.broadcast %cst_25 : f32 to vector<8x128xf32>
    %67 = arith.mulf %66, %63 : vector<8x128xf32>
    %68 = arith.select %65, %63, %67 : vector<8x128xi1>, vector<8x128xf32>
    %c6 = arith.constant 6 : index
    %c0_26 = arith.constant 0 : index
    %69 = vector.load %arg3[%c6, %c0_26] : memref<8x128xf32, #tpu.memory_space<vmem>>, vector<1x128xf32>
    %c7 = arith.constant 7 : index
    %c0_27 = arith.constant 0 : index
    %70 = vector.load %arg3[%c7, %c0_27] : memref<8x128xf32, #tpu.memory_space<vmem>>, vector<1x1xf32>
    %71 = vector.broadcast %69 : vector<1x128xf32> to vector<8x128xf32>
    %72 = arith.mulf %68, %71 : vector<8x128xf32>
    %cst_28 = arith.constant dense<0.000000e+00> : vector<8xf32>
    %73 = vector.multi_reduction <add>, %72, %cst_28 [1] : vector<8x128xf32> to vector<8xf32>
    %74 = vector.shape_cast %73 : vector<8xf32> to vector<8x1xf32>
    %75 = vector.broadcast %70 : vector<1x1xf32> to vector<8x1xf32>
    %76 = arith.addf %74, %75 : vector<8x1xf32>
    %77 = arith.negf %76 : vector<8x1xf32>
    %78 = math.exp %77 : vector<8x1xf32>
    %cst_29 = arith.constant 1.000000e+00 : f32
    %79 = vector.broadcast %cst_29 : f32 to vector<8x1xf32>
    %80 = arith.addf %79, %78 : vector<8x1xf32>
    %81 = arith.divf %79, %80 : vector<8x1xf32>
    %c0_30 = arith.constant 0 : index
    %c0_31 = arith.constant 0 : index
    %82 = vector.load %arg4[%c0_30, %c0_31] : memref<8x1xf32, #tpu.memory_space<vmem>>, vector<8x1xf32>
    tpu.vector_store %arg4[%c0_30, %c0_31], %81 {strides = array<i32>} : memref<8x1xf32, #tpu.memory_space<vmem>>, vector<8x1xf32>,
    return
  }
  func.func @transform_0(%arg0: i32) -> (i32, i32) {
    %c0_i32 = arith.constant 0 : i32
    %c0_i32_0 = arith.constant 0 : i32
    return %arg0, %c0_i32 : i32, i32
  }
  func.func @transform_1(%arg0: i32) -> (i32, i32) {
    %c0_i32 = arith.constant 0 : i32
    %c0_i32_0 = arith.constant 0 : i32
    %c0_i32_1 = arith.constant 0 : i32
    return %c0_i32, %c0_i32_0 : i32, i32
  }
  func.func @transform_2(%arg0: i32) -> (i32, i32) {
    %c0_i32 = arith.constant 0 : i32
    %c0_i32_0 = arith.constant 0 : i32
    %c0_i32_1 = arith.constant 0 : i32
    return %c0_i32, %c0_i32_0 : i32, i32
  }
  func.func @transform_3(%arg0: i32) -> (i32, i32) {
    %c0_i32 = arith.constant 0 : i32
    %c0_i32_0 = arith.constant 0 : i32
    return %arg0, %c0_i32 : i32, i32
  }
}

</mosaic_0001>

<bundles_post_ra>
// kernel: tpu_custom_call.1
= control target key start
LH: loop header
LB: loop body
LE: loop exit
PB: predicated region body
PF: predicated region fallthrough
CT: control target
= control target key end

     0   :  { %8 = vsyncpa [#allocation3], 0  ;;  %s534_s0 = inlined_call_operand.hbm [shape: f32[8,32], index: 0, kind: input, shape index: {}]   ;;  %s535_s1 = inlined_call_operand.hbm [shape: f32[256,128], index: 1, kind: input, shape index: {}]   ;;  %s536_s2 = inlined_call_operand.hbm [shape: f32[8,128], index: 2, kind: input, shape index: {}]   ;;  %s537_s3 = inlined_call_operand.vmem [shape: f32[8,1], index: 3, kind: output, shape index: {}]  }
   0x1   :  { %9 = vsyncpa [#allocation5], 0  ;;  %s467_s12 = smov [#allocation4]  }
   0x2   :  { %s25_s13 = sshll.u32 %s467_s12, 4  ;;  %s26_s13 = int_to_ptr.vmem [resolvable:$true] %s25_s13 }
   0x3   :  { %s411_s14 = scalar_lea.vmem %s26_s13, 4096  ;;  %p416_p1 = scmp.lt.s32.totalorder %s26_s13, %s26_s13 }
   0x4   :  { %p412_p0 = scmp.ne.s32.totalorder %s26_s13, %s411_s14  ;;  %p417_p2 = scmp.lt.s32.totalorder %s411_s14, %s411_s14 }
   0x6   :  { %p418_p3 = por %p417_p2, %p416_p1 }
   0x8   :  { %p419_p4 = pnand %p418_p3, %p412_p0 }
   0xa   :  { %422 = shalt.err (!%p419_p4)
}
   0xb   :  { %s468_s15 = smov 128   ;;  %s469_s16 = smov 8  }
   0xc   :  { %31 = dma.hbm_to_vmem [thread:$0]  %s535_s1, 4096, %s26_s13, [#allocation5], %s468_s15, %s468_s15, %s469_s16  }
   0xd   :  { %s470_s19 = smov [#allocation2]   ;;  %s471_s21 = smov [#allocation6]  }
   0xe   :  { %s16_s20 = sshll.u32 %s470_s19, 4  ;;  %s38_s22 = sshll.u32 %s471_s21, 4  ;;  %s17_s20 = int_to_ptr.vmem [resolvable:$true] %s16_s20  ;;  %s39_s22 = int_to_ptr.vmem [resolvable:$true] %s38_s22 }
   0xf   :  { %s431_s23 = scalar_lea.vmem %s17_s20, 128  ;;  %p436_p6 = scmp.lt.s32.totalorder %s17_s20, %s17_s20 }
  0x10   :  { %p432_p5 = scmp.ne.s32.totalorder %s17_s20, %s431_s23  ;;  %p437_p7 = scmp.lt.s32.totalorder %s431_s23, %s431_s23 }
  0x12   :  { %p438_p8 = por %p437_p7, %p436_p6 }
  0x14   :  { %p439_p9 = pnand %p438_p8, %p432_p5 }
  0x16   :  { %442 = shalt.err (!%p439_p9)
}
  0x17   :  { %19 = dma.hbm_to_vmem [thread:$0]  %s534_s0, 128, %s17_s20, [#allocation3]  }
  0x18   :  { %s451_s26 = scalar_lea.vmem %s39_s22, 128  ;;  %p456_p11 = scmp.lt.s32.totalorder %s39_s22, %s39_s22 }
  0x19   :  { %p452_p10 = scmp.ne.s32.totalorder %s39_s22, %s451_s26  ;;  %p457_p12 = scmp.lt.s32.totalorder %s451_s26, %s451_s26 }
  0x1b   :  { %p458_p13 = por %p457_p12, %p456_p11 }
  0x1d   :  { %p459_p0 = pnand %p458_p13, %p452_p10 }
  0x1f   :  { %462 = shalt.err (!%p459_p0)
}
  0x20   :  { %41 = dma.hbm_to_vmem [thread:$0]  %s536_s2, 128, %s39_s22, [#allocation5]  }
  0x21   :  { %463 = dma.done.wait [#allocation3], 128  }
  0x22   :  { %464 = vsyncadd [#allocation3], 4294967168 }
  0x23   :  { %465 = dma.done.wait [#allocation5], 4224  }
  0x24   :  { %466 = vsyncadd [#allocation5], 4294963072  ;;  %v472_v0 = vmov 0.0   ;;  %vm473_vm0 = vmmov 0   ;;  %v55_v1 = vld [vmem:[#allocation4 + $0x18] sm:$0xff]  ;;  %v54_v2 = vld [vmem:[#allocation4 + $0x10] sm:$0xff] }
  0x25   :  { %342 = vmatprep.subr.mxu0 %v472_v0  ;;  %350 = vmatprep.mubr.msk.f32.mxu0 %vm473_vm0, %v472_v0  ;;  %v53_v3 = vld [vmem:[#allocation4 + $0x8] sm:$0xff]  ;;  %v52_v4 = vld [vmem:[#allocation4] sm:$0xff]  ;;  %v51_v5 = vld [vmem:[#allocation2] sm:$0xff]  ;;  %vm61_vm1 = vcmask 261120   ;;  %vm302_vm4 = vcmask 7168  }
  0x26   :  { %353 = vmatprep.subr.mxu1 %v472_v0  ;;  %385 = vmatprep.mubr.msk.f32.mxu1 %vm473_vm0, %v472_v0  ;;  %v310_v6 = vld [vmem:[#allocation6] ss:$0 sm:$0xff]  ;;  %v178_v11 = vld [vmem:[#allocation4 + $0xf8] sm:$0xff]  ;;  %v177_v12 = vld [vmem:[#allocation4 + $0xf0] sm:$0xff] }
  0x27   :  { %343 = vmatpush3.msra.mxu0 %v55_v1  ;;  %354 = vmatpush3.msra.mxu1 %v178_v11  ;;  %v176_v13 = vld [vmem:[#allocation4 + $0xe8] sm:$0xff]  ;;  %v175_v14 = vld [vmem:[#allocation4 + $0xe0] sm:$0xff]  ;;  %v174_v15 = vld [vmem:[#allocation4 + $0xd8] sm:$0xff] }
  0x28   :  { %344 = vmatprep.subr.mxu0 %v472_v0  ;;  %355 = vmatprep.subr.mxu1 %v472_v0  ;;  %v173_v16 = vld [vmem:[#allocation4 + $0xd0] sm:$0xff]  ;;  %v172_v17 = vld [vmem:[#allocation4 + $0xc8] sm:$0xff]  ;;  %v171_v18 = vld [vmem:[#allocation4 + $0xc0] sm:$0xff] }
  0x29   :  { %345 = vmatpush3.msra.mxu0 %v54_v2  ;;  %356 = vmatpush3.msra.mxu1 %v177_v12  ;;  %v170_v19 = vld [vmem:[#allocation4 + $0xb8] sm:$0xff]  ;;  %v169_v20 = vld [vmem:[#allocation4 + $0xb0] sm:$0xff]  ;;  %v168_v21 = vld [vmem:[#allocation4 + $0xa8] sm:$0xff] }
  0x2a   :  { %346 = vmatprep.subr.mxu0 %v472_v0  ;;  %357 = vmatprep.subr.mxu1 %v472_v0  ;;  %v167_v22 = vld [vmem:[#allocation4 + $0xa0] sm:$0xff]  ;;  %v166_v23 = vld [vmem:[#allocation4 + $0x98] sm:$0xff]  ;;  %v165_v24 = vld [vmem:[#allocation4 + $0x90] sm:$0xff] }
  0x2b   :  { %347 = vmatpush3.msra.mxu0 %v53_v3  ;;  %358 = vmatpush3.msra.mxu1 %v176_v13  ;;  %v164_v25 = vld [vmem:[#allocation4 + $0x88] sm:$0xff]  ;;  %v163_v26 = vld [vmem:[#allocation4 + $0x80] sm:$0xff] }
  0x2c   :  { %348 = vmatprep.subr.mxu0 %v472_v0  ;;  %359 = vmatprep.subr.mxu1 %v472_v0  ;;  %v312_v36 = vld [vmem:[#allocation6 + $0x2] ss:$0 sm:$0xff]  ;;  %v313_v38 = vld [vmem:[#allocation6 + $0x4] ss:$0 sm:$0xff]  ;;  %v314_v43 = vld [vmem:[#allocation6 + $0x1] ss:$0 sm:$0xff] }
  0x2d   :  { %349 = vmatpush3.msra.mxu0 %v52_v4  ;;  %360 = vmatpush3.msra.mxu1 %v175_v14  ;;  %v315_v57 = vld [vmem:[#allocation6 + $0x3] ss:$0 sm:$0xff]  ;;  %v316_v59 = vld [vmem:[#allocation6 + $0x5] ss:$0 sm:$0xff]  ;;  %v317_v63 = vld [vmem:[#allocation6 + $0x6] ss:$0 sm:$0xff] }
  0x2e   :  { %351 = vmatmul.mubr.msk.f32.vlgmr.msra.gmra.mxu0 %vm61_vm1, %v51_v5  ;;  %361 = vmatprep.subr.mxu1 %v472_v0  ;;  %v318_v2 = vld [vmem:[#allocation6 + $0x7] ss:$0 sm:$0xff] }
  0x2f   :  { %362 = vmatpush3.msra.mxu1 %v174_v15 }
  0x30   :  { %363 = vmatprep.subr.mxu1 %v472_v0 }
  0x31   :  { %364 = vmatpush3.msra.mxu1 %v173_v16 }
  0x32   :  { %365 = vmatprep.subr.mxu1 %v472_v0 }
  0x33   :  { %366 = vmatpush3.msra.mxu1 %v172_v17 }
  0x34   :  { %367 = vmatprep.subr.mxu1 %v472_v0 }
  0x35   :  { %368 = vmatpush3.msra.mxu1 %v171_v18 }
  0x36   :  { %369 = vmatprep.subr.mxu1 %v472_v0 }
  0x37   :  { %370 = vmatpush3.msra.mxu1 %v170_v19 }
  0x38   :  { %371 = vmatprep.subr.mxu1 %v472_v0 }
  0x39   :  { %372 = vmatpush3.msra.mxu1 %v169_v20 }
  0x3a   :  { %373 = vmatprep.subr.mxu1 %v472_v0 }
  0x3b   :  { %374 = vmatpush3.msra.mxu1 %v168_v21 }
  0x3c   :  { %375 = vmatprep.subr.mxu1 %v472_v0 }
  0x3d   :  { %376 = vmatpush3.msra.mxu1 %v167_v22 }
  0x3e   :  { %377 = vmatprep.subr.mxu1 %v472_v0 }
  0x3f   :  { %378 = vmatpush3.msra.mxu1 %v166_v23 }
  0x40   :  { %379 = vmatprep.subr.mxu1 %v472_v0 }
  0x41   :  { %380 = vmatpush3.msra.mxu1 %v165_v24 }
  0x42   :  { %381 = vmatprep.subr.mxu1 %v472_v0 }
  0x43   :  { %382 = vmatpush3.msra.mxu1 %v164_v25 }
  0x44   :  { %383 = vmatprep.subr.mxu1 %v472_v0 }
  0x45   :  { %384 = vmatpush3.msra.mxu1 %v163_v26 }
  0xee   :  { %v131_v7 = vpop.f32.mrf.mxu0 }
  0xef   :  { %v510_v8 = vadd.f32 %v310_v6, %v131_v7 }
  0xf0   :  { %v352_v9 = vpop.f32.mrf.mxu0 }
  0xf1   :  { %137 = vadd.xlane.f32.xlu0 %v510_v8  ;;  %v140_v10 = vmul.f32 %v510_v8, %v510_v8 }
  0xf5   :  { %141 = vadd.xlane.f32.xlu0 %v140_v10 }
 0x17a   :  { %v138_v27 = vpop.xlane.xlu0 %137 }
 0x17b   :  { %v139_v28 = vmul.f32 0.015625, %v138_v27 }
 0x17d   :  { %v144_v30 = vmul.f32 %v139_v28, %v139_v28  ;;  %v146_v34 = vsub.f32 %v510_v8, %v139_v28 }
 0x17e   :  { %v142_v29 = vpop.xlane.xlu0 %141 }
 0x17f   :  { %v143_v31 = vmul.f32 0.015625, %v142_v29 }
 0x181   :  { %v145_v32 = vsub.f32 %v143_v31, %v144_v30 }
 0x183   :  { %v147_v33 = vadd.f32 1e-05, %v145_v32 }
 0x185   :  { %395 = vrsqrt.f32 %v147_v33 }
 0x192   :  { %v396_v35 = vpop.eup %395 }
 0x193   :  { %v149_v37 = vmul.f32 %v396_v35, %v146_v34 }
 0x195   :  { %v154_v39 = vmul.f32 %v312_v36, %v149_v37 }
 0x197   :  { %v159_v40 = vadd.f32 %v313_v38, %v154_v39 }
 0x199   :  { %vm160_vm2 = vcmp.gt.f32.partialorder %v159_v40, 0.0  ;;  %v161_v41 = vmul.f32 0.2, %v159_v40 }
 0x19b   :  { %v162_v42 = vsel %vm160_vm2, %v159_v40, %v161_v41 }
 0x19c   :  { %386 = vmatmul.mubr.f32.vlgmr.msra.gmra.mxu1 %v162_v42 }
 0x25c   :  { %v250_v44 = vpop.f32.mrf.mxu1 }
 0x25d   :  { %v251_v45 = vadd.f32 %v314_v43, %v250_v44 }
 0x25e   :  { %v387_v46 = vpop.f32.mrf.mxu1 }
 0x25f   :  { %256 = vadd.xlane.f32.xlu1 %v251_v45  ;;  %v259_v47 = vmul.f32 %v251_v45, %v251_v45 }
 0x263   :  { %260 = vadd.xlane.f32.xlu1 %v259_v47 }
 0x2e8   :  { %v257_v48 = vpop.xlane.xlu1 %256 }
 0x2e9   :  { %v258_v49 = vmul.f32 0.015625, %v257_v48 }
 0x2eb   :  { %v263_v51 = vmul.f32 %v258_v49, %v258_v49  ;;  %v265_v55 = vsub.f32 %v251_v45, %v258_v49 }
 0x2ec   :  { %v261_v50 = vpop.xlane.xlu1 %260 }
 0x2ed   :  { %v262_v52 = vmul.f32 0.015625, %v261_v50 }
 0x2ef   :  { %v264_v53 = vsub.f32 %v262_v52, %v263_v51 }
 0x2f1   :  { %v266_v54 = vadd.f32 1e-05, %v264_v53 }
 0x2f3   :  { %397 = vrsqrt.f32 %v266_v54 }
 0x300   :  { %v398_v56 = vpop.eup %397 }
 0x301   :  { %v268_v58 = vmul.f32 %v398_v56, %v265_v55 }
 0x303   :  { %v273_v60 = vmul.f32 %v315_v57, %v268_v58 }
 0x305   :  { %v278_v61 = vadd.f32 %v316_v59, %v273_v60 }
 0x307   :  { %vm279_vm3 = vcmp.gt.f32.partialorder %v278_v61, 0.0  ;;  %v280_v62 = vmul.f32 0.2, %v278_v61 }
 0x309   :  { %v281_v0 = vsel %vm279_vm3, %v278_v61, %v280_v62 }
 0x30a   :  { %v288_v1 = vmul.f32 %v317_v63, %v281_v0 }
 0x30c   :  { %289 = vadd.xlane.f32.xlu0 %v288_v1 }
 0x395   :  { %v290_v3 = vpop.xlane.xlu0 %289 }
 0x396   :  { %v295_v4 = vadd.f32 %v318_v2, %v290_v3 }
 0x398   :  { %v319_v5 = vmul.f32 -1.442695, %v295_v4 }
 0x39a   :  { %399 = vpow2.f32 %v319_v5 }
 0x3a7   :  { %v400_v6 = vpop.eup %399 }
 0x3a8   :  { %v299_v7 = vadd.f32 1.0, %v400_v6 }
 0x3aa   :  { %401 = vrcp.f32 %v299_v7 }
 0x3b7   :  { %v402_v8 = vpop.eup %401 }
 0x3b8   :  { %303 = vst.msk [vmem:[%s537_s3] sm:$0xff] %vm302_vm4, %v402_v8 }
 0x3b9   :  { %308 = vsyncpa [#allocation3], 1 }
 0x3ba   :  { %309 = vsyncpa [#allocation5], 1 }

</bundles_post_ra>
